<compile_context>
chip_gen: v6e
topology: v6e:2x2x1
jax: 0.10.0
libtpu: 0.0.40
codegen_flags: <defaults>
</compile_context>

<pallas_src>
import functools

import jax
import jax.numpy as jnp
from jax.experimental import pallas as pl
from jax.experimental.pallas import tpu as pltpu

LANE = 128


def _round_up(x: int, m: int) -> int:
    return ((x + m - 1) // m) * m


def _cdiv(a: int, b: int) -> int:
    return -(-a // b)


@functools.lru_cache(maxsize=1)
def _tpu_generation_info():
    """Best-effort (vmem_capacity_bytes, is_v5, is_dual_tensorcore)."""
    vmem_cap = 64 << 20  # conservative fallback (v7x per-TC VMEM)
    is_v5 = False
    dual_tc = False
    try:
        vmem_cap = int(pltpu.get_tpu_info().vmem_capacity_bytes)
    except Exception:
        pass
    try:
        kind = jax.devices()[0].device_kind.lower()
        is_v5 = "v5" in kind
        dual_tc = "v7" in kind
    except Exception:
        pass
    return vmem_cap, is_v5, dual_tc


def _make_mlp_kernel(num_layers: int, bf16_epilogue: bool):
    """Fused MLP kernel: all layers evaluated per batch tile (weights resident)."""

    def kernel(x_ref, *refs):
        # refs = (w0, b0, w1, b1, ..., w_{L-1}, b_{L-1}, out_ref)
        out_ref = refs[-1]
        param_refs = refs[:-1]
        h = x_ref[...]                                   # bf16 (TILE_N, F0_pad)
        for i in range(num_layers):
            w = param_refs[2 * i][...]                   # bf16 (in_pad, out_pad)
            b = param_refs[2 * i + 1][...]               # f32  (1, out_pad)
            acc = jnp.dot(h, w, preferred_element_type=jnp.float32)
            if i != num_layers - 1:
                if bf16_epilogue:
                    # v6e/v7x: bf16 VPU -> halve vreg pressure on the epilogue.
                    hb = acc.astype(jnp.bfloat16) + b.astype(jnp.bfloat16)
                    h = jnp.maximum(hb, jnp.zeros_like(hb))
                else:
                    # v5e: no bf16 VPU -> keep bias/ReLU in f32.
                    h = jnp.maximum(acc + b, 0.0).astype(jnp.bfloat16)
            else:
                h = acc + b                              # final bias add in f32
        out_ref[...] = h.astype(out_ref.dtype)

    return kernel


def init_linear_model_params(key, input_layer: int, hidden_layers, result_layer: int):
    """Deterministic parameter init matching nn.Linear shapes.

    Returns list of (W, b) with W of shape (in, out) (PyTorch's (out, in)
    transposed) and b of shape (1, out).
    """
    dims = [input_layer] + list(hidden_layers) + [result_layer]
    params = []
    for i in range(len(dims) - 1):
        fan_in, fan_out = dims[i], dims[i + 1]
        key, kw, kb = jax.random.split(key, 3)
        bound = 1.0 / jnp.sqrt(jnp.float32(fan_in))
        w = jax.random.uniform(kw, (fan_in, fan_out), jnp.float32, -bound, bound)
        b = jax.random.uniform(kb, (1, fan_out), jnp.float32, -bound, bound)
        params.append((w, b))
    return params


def _pad_params(params):
    """Zero-pad feature dims to multiples of 128; bf16 weights, f32 biases."""
    flat = []
    for w, b in params:
        in_pad = _round_up(w.shape[0], LANE)
        out_pad = _round_up(w.shape[1], LANE)
        w_p = jnp.pad(
            w.astype(jnp.bfloat16),
            ((0, in_pad - w.shape[0]), (0, out_pad - w.shape[1])),
        )
        b_p = jnp.pad(b.astype(jnp.float32), ((0, 0), (0, out_pad - b.shape[1])))
        flat.extend([w_p, b_p])
    return tuple(flat)


@functools.partial(
    jax.jit,
    static_argnames=(
        "tile_n", "bf16_epilogue", "out_dtype", "vmem_cap", "single_buffer_params",
    ),
)
def _mlp_pallas(x_pad, flat_params, *, tile_n, bf16_epilogue, out_dtype,
                vmem_cap, single_buffer_params):
    num_layers = len(flat_params) // 2
    n_pad, f_in_pad = x_pad.shape
    out_pad = flat_params[-2].shape[-1]
    out_itemsize = jnp.dtype(out_dtype).itemsize

    grid = (n_pad // tile_n,)

    # x/out: tiled over the batch (double-buffered by Pallas);
    # weights/biases: constant block index -> VMEM-resident across all steps,
    # single-buffered so no second revolving buffer is allocated.
    in_specs = [pl.BlockSpec((tile_n, f_in_pad), lambda i: (i, 0))]
    for p in flat_params:
        if single_buffer_params:
            in_specs.append(
                pl.BlockSpec(p.shape, lambda i: (0, 0), pipeline_mode=pl.Buffered(1))
            )
        else:
            in_specs.append(pl.BlockSpec(p.shape, lambda i: (0, 0)))
    out_specs = pl.BlockSpec((tile_n, out_pad), lambda i: (i, 0))

    # Cost estimate (advisory).
    dims = [f_in_pad] + [flat_params[2 * i].shape[1] for i in range(num_layers)]
    flops = 2 * n_pad * sum(dims[i] * dims[i + 1] for i in range(num_layers))
    w_bytes = sum(int(p.size) * p.dtype.itemsize for p in flat_params)
    bytes_accessed = n_pad * f_in_pad * 2 + w_bytes + n_pad * out_pad * out_itemsize

    # Generation-aware VMEM budget.
    param_factor = 1 if single_buffer_params else 2
    needed = (
        param_factor * w_bytes                    # resident params
        + 2 * tile_n * f_in_pad * 2               # double-buffered bf16 x tile
        + 2 * tile_n * out_pad * out_itemsize     # double-buffered out tile
        + 2 * tile_n * max(dims) * 4              # live f32 intermediates
    )
    # v7x (64 MiB physical): leave ~8 MiB for compiler scratch.
    # v5e/v6e (128 MiB physical): allow up to ~112 MiB.
    headroom = (8 << 20) if vmem_cap <= (64 << 20) else (16 << 20)
    cap = max(vmem_cap - headroom, 8 << 20)
    vmem_limit = int(min(max(needed + (4 << 20), 8 << 20), cap))

    kernel = _make_mlp_kernel(num_layers, bf16_epilogue)
    return pl.pallas_call(
        kernel,
        out_shape=jax.ShapeDtypeStruct((n_pad, out_pad), out_dtype),
        grid=grid,
        in_specs=in_specs,
        out_specs=out_specs,
        compiler_params=pltpu.CompilerParams(
            dimension_semantics=("parallel",),
            vmem_limit_bytes=vmem_limit,
        ),
        cost_estimate=pl.CostEstimate(
            flops=flops, transcendentals=0, bytes_accessed=int(bytes_accessed)
        ),
    )(x_pad, *flat_params)


def linear_model_forward(x, params, entry_size: int, out_dtype=jnp.float32):
    """Mirror of LinearModel.forward (inference path).

    out_dtype=jnp.bfloat16 cuts the dominant HBM writeback ~2x when the caller
    tolerates bf16 outputs; default f32 preserves exact final-layer accumulation.
    """
    if x.shape[0] != entry_size:
        raise ValueError("Entry values for model are invalid!")
    n = x.shape[0]
    x2d = x.reshape(n, -1)                               # x.view(x.size(0), -1)
    f_in = x2d.shape[1]
    result_layer = params[-1][1].shape[-1]

    vmem_cap, is_v5, dual_tc = _tpu_generation_info()
    bf16_epilogue = not is_v5

    flat_params = _pad_params(params)
    f_in_pad = _round_up(f_in, LANE)
    dims_pad = [f_in_pad] + [flat_params[2 * i].shape[1] for i in range(len(params))]
    w_bytes = sum(int(p.size) * p.dtype.itemsize for p in flat_params)

    # --- Batch tile selection ---------------------------------------------
    # Target 1024 rows (mem-bound regime: bigger tiles -> better HBM roofline),
    # minimize padding waste, guarantee >=2 grid steps on dual-TC v7x.
    target_tile = 1024
    min_steps = 2 if (dual_tc and n >= 32) else 1
    steps = max(_cdiv(max(n, 1), target_tile), min_steps)
    tile_n = _round_up(_cdiv(max(n, 1), steps), 16)

    # Shrink the tile if resident weights + activation tiles would blow VMEM.
    def _act_bytes(t):
        return 2 * t * dims_pad[0] * 2 + 2 * t * dims_pad[-1] * 4 + 2 * t * max(dims_pad) * 4

    vmem_budget = max(vmem_cap - (12 << 20), 4 << 20)
    while tile_n > 16 and w_bytes + _act_bytes(tile_n) > vmem_budget:
        tile_n = max(16, _round_up(tile_n // 2, 16))
    # TODO(synk): if padded weights alone exceed the VMEM budget (very wide
    # MLPs, tightest on v7x), stream weights layer-by-layer with
    # pltpu.emit_pipeline instead of constant-index resident specs.

    n_pad = _round_up(max(n, 1), tile_n)

    # --- Pad / cast activations (skip the extra pass when already aligned) ---
    x2d_bf16 = x2d.astype(jnp.bfloat16)
    if n_pad == n and f_in_pad == f_in:
        x_pad = x2d_bf16
    else:
        x_pad = jnp.pad(x2d_bf16, ((0, n_pad - n), (0, f_in_pad - f_in)))

    try:
        out_padded = _mlp_pallas(
            x_pad, flat_params, tile_n=tile_n, bf16_epilogue=bf16_epilogue,
            out_dtype=out_dtype, vmem_cap=vmem_cap, single_buffer_params=True)
    except Exception:
        # pl.Buffered(1) not accepted by this jax version -> default buffering.
        out_padded = _mlp_pallas(
            x_pad, flat_params, tile_n=tile_n, bf16_epilogue=bf16_epilogue,
            out_dtype=out_dtype, vmem_cap=vmem_cap, single_buffer_params=False)

    return out_padded[:n, :result_layer]                 # slice off lane/batch padding


def _reference_forward(x, params, bf16_epilogue):
    """Pure-JAX reference with the same bf16-feed / f32-accumulate numerics."""
    h = x.reshape(x.shape[0], -1).astype(jnp.bfloat16)
    num_layers = len(params)
    for i, (w, b) in enumerate(params):
        acc = jnp.dot(h, w.astype(jnp.bfloat16), preferred_element_type=jnp.float32)
        if i != num_layers - 1:
            if bf16_epilogue:
                hb = acc.astype(jnp.bfloat16) + b.astype(jnp.bfloat16)
                h = jnp.maximum(hb, jnp.zeros_like(hb))
            else:
                h = jnp.maximum(acc + b.astype(jnp.float32), 0.0).astype(jnp.bfloat16)
        else:
            h = acc + b.astype(jnp.float32)
    return h


if __name__ == "__main__":
    # Shapes consistent with the module: forward requires x.size(0) == input_layer
    # and the flattened feature count equals the first Linear's fan_in.
    input_layer = 8
    hidden_layers = [32, 16]
    result_layer = 4

    key = jax.random.PRNGKey(0)
    kx, kp = jax.random.split(key)

    # x: (8, 2, 4) -> view -> (8, 8); x.size(0) == input_layer == 8
    x = jax.random.normal(kx, (input_layer, 2, 4), dtype=jnp.float32)
    params = init_linear_model_params(kp, input_layer, hidden_layers, result_layer)

    out = linear_model_forward(x, params, entry_size=input_layer)
    out = jax.block_until_ready(out)

    _, _is_v5, _ = _tpu_generation_info()
    ref = _reference_forward(x, params, bf16_epilogue=not _is_v5)
    assert out.shape == (input_layer, result_layer)
    assert jnp.allclose(out, ref.astype(out.dtype), atol=1e-2, rtol=1e-2), "mismatch vs reference"

    # TODO(synk): train/evaluate/predict (CrossEntropyLoss, Adam, argmax loops)
    # are host-side training utilities, not part of the forward pass; not
    # translated to Pallas.
    print("KERNEL_OK")
</pallas_src>

<mosaic_0001>
module attributes {stable_mosaic.version = 11 : i64} {
  func.func @kernel(%arg0: i32, %arg1: memref<16x128xbf16, #tpu.memory_space<vmem>>, %arg2: memref<128x128xbf16, #tpu.memory_space<vmem>>, %arg3: memref<1x128xf32, #tpu.memory_space<vmem>>, %arg4: memref<128x128xbf16, #tpu.memory_space<vmem>>, %arg5: memref<1x128xf32, #tpu.memory_space<vmem>>, %arg6: memref<128x128xbf16, #tpu.memory_space<vmem>>, %arg7: memref<1x128xf32, #tpu.memory_space<vmem>>, %arg8: memref<16x128xf32, #tpu.memory_space<vmem>>) attributes {dimension_semantics = [#tpu.dimension_semantics<parallel>], iteration_bounds = array<i64: 1>, scalar_prefetch = 0 : i64, scratch_operands = 0 : i64, tpu.core_type = #tpu.core_type<tc>, window_params = [{transform_indices = @transform_0, window_bounds = array<i64: 16, 128>}, {pipeline_mode = #tpu.pipeline_mode<synchronous>, transform_indices = @transform_1, window_bounds = array<i64: 128, 128>}, {pipeline_mode = #tpu.pipeline_mode<synchronous>, transform_indices = @transform_2, window_bounds = array<i64: 1, 128>}, {pipeline_mode = #tpu.pipeline_mode<synchronous>, transform_indices = @transform_3, window_bounds = array<i64: 128, 128>}, {pipeline_mode = #tpu.pipeline_mode<synchronous>, transform_indices = @transform_4, window_bounds = array<i64: 1, 128>}, {pipeline_mode = #tpu.pipeline_mode<synchronous>, transform_indices = @transform_5, window_bounds = array<i64: 128, 128>}, {pipeline_mode = #tpu.pipeline_mode<synchronous>, transform_indices = @transform_6, window_bounds = array<i64: 1, 128>}, {transform_indices = @transform_7, window_bounds = array<i64: 16, 128>}]} {
    %c0 = arith.constant 0 : index
    %c0_0 = arith.constant 0 : index
    %0 = vector.load %arg1[%c0, %c0_0] : memref<16x128xbf16, #tpu.memory_space<vmem>>, vector<16x128xbf16>
    %c0_1 = arith.constant 0 : index
    %c0_2 = arith.constant 0 : index
    %1 = vector.load %arg2[%c0_1, %c0_2] : memref<128x128xbf16, #tpu.memory_space<vmem>>, vector<128x128xbf16>
    %c0_3 = arith.constant 0 : index
    %c0_4 = arith.constant 0 : index
    %2 = vector.load %arg3[%c0_3, %c0_4] : memref<1x128xf32, #tpu.memory_space<vmem>>, vector<1x128xf32>
    %cst = arith.constant dense<0.000000e+00> : vector<16x128xf32>
    %3 = tpu.matmul %0, %1, %cst {dimension_numbers = #tpu.dot_dimension_numbers<[1], [0], [0], [1], [0, 0, 1, 1], [], []>} : vector<16x128xbf16>, vector<128x128xbf16>, vector<16x128xf32> -> vector<16x128xf32>
    %4 = arith.truncf %3 : vector<16x128xf32> to vector<16x128xbf16>
    %5 = arith.truncf %2 : vector<1x128xf32> to vector<1x128xbf16>
    %6 = vector.broadcast %5 : vector<1x128xbf16> to vector<16x128xbf16>
    %7 = arith.addf %4, %6 : vector<16x128xbf16>
    %cst_5 = arith.constant 0.000000e+00 : bf16
    %8 = vector.broadcast %cst_5 : bf16 to vector<16x128xbf16>
    %9 = arith.maximumf %7, %8 : vector<16x128xbf16>
    %c0_6 = arith.constant 0 : index
    %c0_7 = arith.constant 0 : index
    %10 = vector.load %arg4[%c0_6, %c0_7] : memref<128x128xbf16, #tpu.memory_space<vmem>>, vector<128x128xbf16>
    %c0_8 = arith.constant 0 : index
    %c0_9 = arith.constant 0 : index
    %11 = vector.load %arg5[%c0_8, %c0_9] : memref<1x128xf32, #tpu.memory_space<vmem>>, vector<1x128xf32>
    %cst_10 = arith.constant dense<0.000000e+00> : vector<16x128xf32>
    %12 = tpu.matmul %9, %10, %cst_10 {dimension_numbers = #tpu.dot_dimension_numbers<[1], [0], [0], [1], [0, 0, 1, 1], [], []>} : vector<16x128xbf16>, vector<128x128xbf16>, vector<16x128xf32> -> vector<16x128xf32>
    %13 = arith.truncf %12 : vector<16x128xf32> to vector<16x128xbf16>
    %14 = arith.truncf %11 : vector<1x128xf32> to vector<1x128xbf16>
    %15 = vector.broadcast %14 : vector<1x128xbf16> to vector<16x128xbf16>
    %16 = arith.addf %13, %15 : vector<16x128xbf16>
    %cst_11 = arith.constant 0.000000e+00 : bf16
    %17 = vector.broadcast %cst_11 : bf16 to vector<16x128xbf16>
    %18 = arith.maximumf %16, %17 : vector<16x128xbf16>
    %c0_12 = arith.constant 0 : index
    %c0_13 = arith.constant 0 : index
    %19 = vector.load %arg6[%c0_12, %c0_13] : memref<128x128xbf16, #tpu.memory_space<vmem>>, vector<128x128xbf16>
    %c0_14 = arith.constant 0 : index
    %c0_15 = arith.constant 0 : index
    %20 = vector.load %arg7[%c0_14, %c0_15] : memref<1x128xf32, #tpu.memory_space<vmem>>, vector<1x128xf32>
    %cst_16 = arith.constant dense<0.000000e+00> : vector<16x128xf32>
    %21 = tpu.matmul %18, %19, %cst_16 {dimension_numbers = #tpu.dot_dimension_numbers<[1], [0], [0], [1], [0, 0, 1, 1], [], []>} : vector<16x128xbf16>, vector<128x128xbf16>, vector<16x128xf32> -> vector<16x128xf32>
    %22 = vector.broadcast %20 : vector<1x128xf32> to vector<16x128xf32>
    %23 = arith.addf %21, %22 : vector<16x128xf32>
    %c0_17 = arith.constant 0 : index
    %c0_18 = arith.constant 0 : index
    %24 = vector.load %arg8[%c0_17, %c0_18] : memref<16x128xf32, #tpu.memory_space<vmem>>, vector<16x128xf32>
    tpu.vector_store %arg8[%c0_17, %c0_18], %23 {strides = array<i32>} : memref<16x128xf32, #tpu.memory_space<vmem>>, vector<16x128xf32>,
    return
  }
  func.func @transform_0(%arg0: i32) -> (i32, i32) {
    %c0_i32 = arith.constant 0 : i32
    %c0_i32_0 = arith.constant 0 : i32
    return %arg0, %c0_i32 : i32, i32
  }
  func.func @transform_1(%arg0: i32) -> (i32, i32) {
    %c0_i32 = arith.constant 0 : i32
    %c0_i32_0 = arith.constant 0 : i32
    %c0_i32_1 = arith.constant 0 : i32
    return %c0_i32, %c0_i32_0 : i32, i32
  }
  func.func @transform_2(%arg0: i32) -> (i32, i32) {
    %c0_i32 = arith.constant 0 : i32
    %c0_i32_0 = arith.constant 0 : i32
    %c0_i32_1 = arith.constant 0 : i32
    return %c0_i32, %c0_i32_0 : i32, i32
  }
  func.func @transform_3(%arg0: i32) -> (i32, i32) {
    %c0_i32 = arith.constant 0 : i32
    %c0_i32_0 = arith.constant 0 : i32
    %c0_i32_1 = arith.constant 0 : i32
    return %c0_i32, %c0_i32_0 : i32, i32
  }
  func.func @transform_4(%arg0: i32) -> (i32, i32) {
    %c0_i32 = arith.constant 0 : i32
    %c0_i32_0 = arith.constant 0 : i32
    %c0_i32_1 = arith.constant 0 : i32
    return %c0_i32, %c0_i32_0 : i32, i32
  }
  func.func @transform_5(%arg0: i32) -> (i32, i32) {
    %c0_i32 = arith.constant 0 : i32
    %c0_i32_0 = arith.constant 0 : i32
    %c0_i32_1 = arith.constant 0 : i32
    return %c0_i32, %c0_i32_0 : i32, i32
  }
  func.func @transform_6(%arg0: i32) -> (i32, i32) {
    %c0_i32 = arith.constant 0 : i32
    %c0_i32_0 = arith.constant 0 : i32
    %c0_i32_1 = arith.constant 0 : i32
    return %c0_i32, %c0_i32_0 : i32, i32
  }
  func.func @transform_7(%arg0: i32) -> (i32, i32) {
    %c0_i32 = arith.constant 0 : i32
    %c0_i32_0 = arith.constant 0 : i32
    return %arg0, %c0_i32 : i32, i32
  }
}

module attributes {stable_mosaic.version = 11 : i64} {
  func.func @kernel(%arg0: i32, %arg1: memref<16x128xbf16, #tpu.memory_space<vmem>>, %arg2: memref<128x128xbf16, #tpu.memory_space<vmem>>, %arg3: memref<1x128xf32, #tpu.memory_space<vmem>>, %arg4: memref<128x128xbf16, #tpu.memory_space<vmem>>, %arg5: memref<1x128xf32, #tpu.memory_space<vmem>>, %arg6: memref<128x128xbf16, #tpu.memory_space<vmem>>, %arg7: memref<1x128xf32, #tpu.memory_space<vmem>>, %arg8: memref<16x128xf32, #tpu.memory_space<vmem>>) attributes {dimension_semantics = [#tpu.dimension_semantics<parallel>], iteration_bounds = array<i64: 1>, scalar_prefetch = 0 : i64, scratch_operands = 0 : i64, tpu.core_type = #tpu.core_type<tc>, window_params = [{transform_indices = @transform_0, window_bounds = array<i64: 16, 128>}, {pipeline_mode = #tpu.pipeline_mode<synchronous>, transform_indices = @transform_1, window_bounds = array<i64: 128, 128>}, {pipeline_mode = #tpu.pipeline_mode<synchronous>, transform_indices = @transform_2, window_bounds = array<i64: 1, 128>}, {pipeline_mode = #tpu.pipeline_mode<synchronous>, transform_indices = @transform_3, window_bounds = array<i64: 128, 128>}, {pipeline_mode = #tpu.pipeline_mode<synchronous>, transform_indices = @transform_4, window_bounds = array<i64: 1, 128>}, {pipeline_mode = #tpu.pipeline_mode<synchronous>, transform_indices = @transform_5, window_bounds = array<i64: 128, 128>}, {pipeline_mode = #tpu.pipeline_mode<synchronous>, transform_indices = @transform_6, window_bounds = array<i64: 1, 128>}, {transform_indices = @transform_7, window_bounds = array<i64: 16, 128>}]} {
    %c0 = arith.constant 0 : index
    %c0_0 = arith.constant 0 : index
    %0 = vector.load %arg1[%c0, %c0_0] : memref<16x128xbf16, #tpu.memory_space<vmem>>, vector<16x128xbf16>
    %c0_1 = arith.constant 0 : index
    %c0_2 = arith.constant 0 : index
    %1 = vector.load %arg2[%c0_1, %c0_2] : memref<128x128xbf16, #tpu.memory_space<vmem>>, vector<128x128xbf16>
    %c0_3 = arith.constant 0 : index
    %c0_4 = arith.constant 0 : index
    %2 = vector.load %arg3[%c0_3, %c0_4] : memref<1x128xf32, #tpu.memory_space<vmem>>, vector<1x128xf32>
    %cst = arith.constant dense<0.000000e+00> : vector<16x128xf32>
    %3 = tpu.matmul %0, %1, %cst {dimension_numbers = #tpu.dot_dimension_numbers<[1], [0], [0], [1], [0, 0, 1, 1], [], []>} : vector<16x128xbf16>, vector<128x128xbf16>, vector<16x128xf32> -> vector<16x128xf32>
    %4 = arith.truncf %3 : vector<16x128xf32> to vector<16x128xbf16>
    %5 = arith.truncf %2 : vector<1x128xf32> to vector<1x128xbf16>
    %6 = vector.broadcast %5 : vector<1x128xbf16> to vector<16x128xbf16>
    %7 = arith.addf %4, %6 : vector<16x128xbf16>
    %cst_5 = arith.constant 0.000000e+00 : bf16
    %8 = vector.broadcast %cst_5 : bf16 to vector<16x128xbf16>
    %9 = arith.maximumf %7, %8 : vector<16x128xbf16>
    %c0_6 = arith.constant 0 : index
    %c0_7 = arith.constant 0 : index
    %10 = vector.load %arg4[%c0_6, %c0_7] : memref<128x128xbf16, #tpu.memory_space<vmem>>, vector<128x128xbf16>
    %c0_8 = arith.constant 0 : index
    %c0_9 = arith.constant 0 : index
    %11 = vector.load %arg5[%c0_8, %c0_9] : memref<1x128xf32, #tpu.memory_space<vmem>>, vector<1x128xf32>
    %cst_10 = arith.constant dense<0.000000e+00> : vector<16x128xf32>
    %12 = tpu.matmul %9, %10, %cst_10 {dimension_numbers = #tpu.dot_dimension_numbers<[1], [0], [0], [1], [0, 0, 1, 1], [], []>} : vector<16x128xbf16>, vector<128x128xbf16>, vector<16x128xf32> -> vector<16x128xf32>
    %13 = arith.truncf %12 : vector<16x128xf32> to vector<16x128xbf16>
    %14 = arith.truncf %11 : vector<1x128xf32> to vector<1x128xbf16>
    %15 = vector.broadcast %14 : vector<1x128xbf16> to vector<16x128xbf16>
    %16 = arith.addf %13, %15 : vector<16x128xbf16>
    %cst_11 = arith.constant 0.000000e+00 : bf16
    %17 = vector.broadcast %cst_11 : bf16 to vector<16x128xbf16>
    %18 = arith.maximumf %16, %17 : vector<16x128xbf16>
    %c0_12 = arith.constant 0 : index
    %c0_13 = arith.constant 0 : index
    %19 = vector.load %arg6[%c0_12, %c0_13] : memref<128x128xbf16, #tpu.memory_space<vmem>>, vector<128x128xbf16>
    %c0_14 = arith.constant 0 : index
    %c0_15 = arith.constant 0 : index
    %20 = vector.load %arg7[%c0_14, %c0_15] : memref<1x128xf32, #tpu.memory_space<vmem>>, vector<1x128xf32>
    %cst_16 = arith.constant dense<0.000000e+00> : vector<16x128xf32>
    %21 = tpu.matmul %18, %19, %cst_16 {dimension_numbers = #tpu.dot_dimension_numbers<[1], [0], [0], [1], [0, 0, 1, 1], [], []>} : vector<16x128xbf16>, vector<128x128xbf16>, vector<16x128xf32> -> vector<16x128xf32>
    %22 = vector.broadcast %20 : vector<1x128xf32> to vector<16x128xf32>
    %23 = arith.addf %21, %22 : vector<16x128xf32>
    %c0_17 = arith.constant 0 : index
    %c0_18 = arith.constant 0 : index
    %24 = vector.load %arg8[%c0_17, %c0_18] : memref<16x128xf32, #tpu.memory_space<vmem>>, vector<16x128xf32>
    tpu.vector_store %arg8[%c0_17, %c0_18], %23 {strides = array<i32>} : memref<16x128xf32, #tpu.memory_space<vmem>>, vector<16x128xf32>,
    return
  }
  func.func @transform_0(%arg0: i32) -> (i32, i32) {
    %c0_i32 = arith.constant 0 : i32
    %c0_i32_0 = arith.constant 0 : i32
    return %arg0, %c0_i32 : i32, i32
  }
  func.func @transform_1(%arg0: i32) -> (i32, i32) {
    %c0_i32 = arith.constant 0 : i32
    %c0_i32_0 = arith.constant 0 : i32
    %c0_i32_1 = arith.constant 0 : i32
    return %c0_i32, %c0_i32_0 : i32, i32
  }
  func.func @transform_2(%arg0: i32) -> (i32, i32) {
    %c0_i32 = arith.constant 0 : i32
    %c0_i32_0 = arith.constant 0 : i32
    %c0_i32_1 = arith.constant 0 : i32
    return %c0_i32, %c0_i32_0 : i32, i32
  }
  func.func @transform_3(%arg0: i32) -> (i32, i32) {
    %c0_i32 = arith.constant 0 : i32
    %c0_i32_0 = arith.constant 0 : i32
    %c0_i32_1 = arith.constant 0 : i32
    return %c0_i32, %c0_i32_0 : i32, i32
  }
  func.func @transform_4(%arg0: i32) -> (i32, i32) {
    %c0_i32 = arith.constant 0 : i32
    %c0_i32_0 = arith.constant 0 : i32
    %c0_i32_1 = arith.constant 0 : i32
    return %c0_i32, %c0_i32_0 : i32, i32
  }
  func.func @transform_5(%arg0: i32) -> (i32, i32) {
    %c0_i32 = arith.constant 0 : i32
    %c0_i32_0 = arith.constant 0 : i32
    %c0_i32_1 = arith.constant 0 : i32
    return %c0_i32, %c0_i32_0 : i32, i32
  }
  func.func @transform_6(%arg0: i32) -> (i32, i32) {
    %c0_i32 = arith.constant 0 : i32
    %c0_i32_0 = arith.constant 0 : i32
    %c0_i32_1 = arith.constant 0 : i32
    return %c0_i32, %c0_i32_0 : i32, i32
  }
  func.func @transform_7(%arg0: i32) -> (i32, i32) {
    %c0_i32 = arith.constant 0 : i32
    %c0_i32_0 = arith.constant 0 : i32
    return %arg0, %c0_i32 : i32, i32
  }
}

</mosaic_0001>

<bundles_post_ra>
// kernel: _mlp_pallas.1
= control target key start
LH: loop header
LB: loop body
LE: loop exit
PB: predicated region body
PF: predicated region fallthrough
CT: control target
= control target key end

     0   :  { %12 = vsyncpa [#allocation3], 0  ;;  %s834_s0 = inlined_call_operand.hbm [shape: bf16[16,128], index: 0, kind: input, shape index: {}]   ;;  %s835_s1 = inlined_call_operand.hbm [shape: bf16[128,128], index: 1, kind: input, shape index: {}]   ;;  %s836_s2 = inlined_call_operand.vmem [shape: f32[1,128], index: 2, kind: input, shape index: {}]   ;;  %s837_s3 = inlined_call_operand.hbm [shape: bf16[128,128], index: 3, kind: input, shape index: {}]   ;;  %s838_s4 = inlined_call_operand.vmem [shape: f32[1,128], index: 4, kind: input, shape index: {}]   ;;  %s839_s5 = inlined_call_operand.hbm [shape: bf16[128,128], index: 5, kind: input, shape index: {}]   ;;  %s840_s6 = inlined_call_operand.vmem [shape: f32[1,128], index: 6, kind: input, shape index: {}]   ;;  %s841_s7 = inlined_call_operand.hbm [shape: f32[16,128], index: 7, kind: output, shape index: {}]  }
   0x1   :  { %13 = vsyncpa [#allocation6], 0 }
   0x2   :  { %14 = vsyncpa [#allocation9], 0 }
   0x3   :  { %15 = vsyncpa [#allocation4], 0  ;;  %s716_s24 = smov [#allocation5]   ;;  %s717_s26 = smov [#allocation2]  }
   0x4   :  { %s33_s25 = sshll.u32 %s716_s24, 4  ;;  %s21_s27 = sshll.u32 %s717_s26, 4  ;;  %s34_s25 = int_to_ptr.vmem [resolvable:$true] %s33_s25  ;;  %s22_s27 = int_to_ptr.vmem [resolvable:$true] %s21_s27 }
   0x5   :  { %s616_s28 = scalar_lea.vmem %s34_s25, 1024  ;;  %p621_p1 = scmp.lt.s32.totalorder %s34_s25, %s34_s25 }
   0x6   :  { %p617_p0 = scmp.ne.s32.totalorder %s34_s25, %s616_s28  ;;  %p622_p2 = scmp.lt.s32.totalorder %s616_s28, %s616_s28 }
   0x8   :  { %p623_p3 = por %p622_p2, %p621_p1 }
   0xa   :  { %p624_p4 = pnand %p623_p3, %p617_p0 }
   0xc   :  { %627 = shalt.err (!%p624_p4)
}
   0xd   :  { %s718_s29 = smov 64   ;;  %s719_s30 = smov 4  }
   0xe   :  { %39 = dma.hbm_to_vmem [thread:$0]  %s835_s1, 1024, %s34_s25, [#allocation6], %s718_s29, %s718_s29, %s719_s30  }
   0xf   :  { %s636_s10 = scalar_lea.vmem %s22_s27, 128  ;;  %p641_p6 = scmp.lt.s32.totalorder %s22_s27, %s22_s27 }
  0x10   :  { %p637_p5 = scmp.ne.s32.totalorder %s22_s27, %s636_s10  ;;  %p642_p7 = scmp.lt.s32.totalorder %s636_s10, %s636_s10 }
  0x12   :  { %p643_p8 = por %p642_p7, %p641_p6 }
  0x14   :  { %p644_p9 = pnand %p643_p8, %p637_p5 }
  0x16   :  { %647 = shalt.err (!%p644_p9)
}
  0x17   :  { %27 = dma.hbm_to_vmem [thread:$0]  %s834_s0, 128, %s22_s27, [#allocation3], %s718_s29, %s718_s29, %s719_s30  }
  0x18   :  { %s720_s13 = smov [#allocation7]   ;;  %s721_s15 = smov [#allocation8]  }
  0x19   :  { %s47_s14 = sshll.u32 %s720_s13, 4  ;;  %s61_s16 = sshll.u32 %s721_s15, 4  ;;  %s48_s14 = int_to_ptr.vmem [resolvable:$true] %s47_s14  ;;  %s62_s16 = int_to_ptr.vmem [resolvable:$true] %s61_s16 }
  0x1a   :  { %s656_s1 = scalar_lea.vmem %s48_s14, 1024  ;;  %p661_p11 = scmp.lt.s32.totalorder %s48_s14, %s48_s14 }
  0x1b   :  { %p657_p10 = scmp.ne.s32.totalorder %s48_s14, %s656_s1  ;;  %p662_p12 = scmp.lt.s32.totalorder %s656_s1, %s656_s1 }
  0x1d   :  { %p663_p13 = por %p662_p12, %p661_p11 }
  0x1f   :  { %p664_p0 = pnand %p663_p13, %p657_p10 }
  0x21   :  { %667 = shalt.err (!%p664_p0)
}
  0x22   :  { %53 = dma.hbm_to_vmem [thread:$0]  %s837_s3, 1024, %s48_s14, [#allocation6], %s718_s29, %s718_s29, %s719_s30  }
  0x23   :  { %s676_s0 = scalar_lea.vmem %s62_s16, 1024  ;;  %p681_p2 = scmp.lt.s32.totalorder %s62_s16, %s62_s16 }
  0x24   :  { %p677_p1 = scmp.ne.s32.totalorder %s62_s16, %s676_s0  ;;  %p682_p3 = scmp.lt.s32.totalorder %s676_s0, %s676_s0 }
  0x26   :  { %p683_p4 = por %p682_p3, %p681_p2 }
  0x28   :  { %p684_p5 = pnand %p683_p4, %p677_p1 }
  0x2a   :  { %687 = shalt.err (!%p684_p5)
}
  0x2b   :  { %67 = dma.hbm_to_vmem [thread:$0]  %s839_s5, 1024, %s62_s16, [#allocation9], %s718_s29, %s718_s29, %s719_s30  }
  0x2c   :  { %708 = dma.done.wait [#allocation3], 128  }
  0x2d   :  { %709 = vsyncadd [#allocation3], 4294967168 }
  0x2e   :  { %710 = dma.done.wait [#allocation6], 2048  }
  0x2f   :  { %711 = vsyncadd [#allocation6], 4294965248 }
  0x30   :  { %712 = dma.done.wait [#allocation9], 1024  }
  0x31   :  { %713 = vsyncadd [#allocation9], 4294966272  ;;  %v722_v0 = vmov 0.0   ;;  %vm723_vm0 = vmmov 0   ;;  %v583_v1 = vld [vmem:[#allocation5 + $0x38] sm:$0xff]   ;;  %v584_v2 = vld [vmem:[#allocation5 + $0x30] sm:$0xff]   ;;  %v202_v23 = vlaneseq }
  0x32   :  { %511 = vmatprep.subr.bf16.mxu0 %v722_v0  ;;  %527 = vmatprep.mubr.msk.bf16.mxu0 %vm723_vm0, %v722_v0  ;;  %v585_v3 = vld [vmem:[#allocation5 + $0x28] sm:$0xff]   ;;  %v592_v4 = vld [vmem:[#allocation7 + $0x38] sm:$0xff]   ;;  %v586_v5 = vld [vmem:[#allocation5 + $0x20] sm:$0xff]   ;;  %v724_v36 = vmov 0   ;;  %s725_s24 = smov [#allocation10]  }
  0x33   :  { %531 = vmatprep.subr.bf16.mxu1 %v722_v0  ;;  %547 = vmatprep.mubr.msk.bf16.mxu1 %vm723_vm0, %v722_v0  ;;  %v593_v6 = vld [vmem:[#allocation7 + $0x30] sm:$0xff]   ;;  %v587_v7 = vld [vmem:[#allocation5 + $0x18] sm:$0xff]   ;;  %v594_v8 = vld [vmem:[#allocation7 + $0x28] sm:$0xff]   ;;  %v203_v26 = vshrl.u32 %v202_v23, 7  ;;  %s444_s25 = sshll.u32 %s725_s24, 4  ;;  %s445_s25 = int_to_ptr.vmem [resolvable:$true] %s444_s25 }
  0x34   :  { %512 = vmatpush3.bf16.msra.mxu0 %v583_v1  ;;  %532 = vmatpush3.bf16.msra.mxu1 %v592_v4  ;;  %v588_v9 = vld [vmem:[#allocation5 + $0x10] sm:$0xff]   ;;  %v595_v10 = vld [vmem:[#allocation7 + $0x20] sm:$0xff]   ;;  %v589_v11 = vld [vmem:[#allocation5 + $0x8] sm:$0xff]   ;;  %p693_p7 = scmp.lt.s32.totalorder %s445_s25, %s445_s25 }
  0x35   :  { %513 = vmatprep.subr.bf16.mxu0 %v722_v0  ;;  %533 = vmatprep.subr.bf16.mxu1 %v722_v0  ;;  %v596_v12 = vld [vmem:[#allocation7 + $0x18] sm:$0xff]   ;;  %v590_v13 = vld [vmem:[#allocation5] sm:$0xff]   ;;  %v597_v15 = vld [vmem:[#allocation7 + $0x10] sm:$0xff]   ;;  %v204_v28 = vsub.s32 0, %v203_v26 }
  0x36   :  { %v591_v14 = vld [vmem:[#allocation2] sm:$0xff]   ;;  %v598_v16 = vld [vmem:[#allocation7 + $0x8] sm:$0xff]   ;;  %v599_v17 = vld [vmem:[#allocation7] sm:$0xff]  }
  0x37   :  { %v600_v18 = vld [vmem:[#allocation8 + $0x38] sm:$0xff]   ;;  %v601_v19 = vld [vmem:[#allocation8 + $0x30] sm:$0xff]   ;;  %v602_v20 = vld [vmem:[#allocation8 + $0x28] sm:$0xff]  }
  0x38   :  { %514 = vmatpush3.bf16.msra.mxu0 %v584_v2  ;;  %534 = vmatpush3.bf16.msra.mxu1 %v593_v6  ;;  %v603_v21 = vld [vmem:[#allocation8 + $0x20] sm:$0xff]   ;;  %v604_v22 = vld [vmem:[#allocation8 + $0x18] sm:$0xff]   ;;  %v605_v38 = vld [vmem:[#allocation8 + $0x10] sm:$0xff]  }
  0x39   :  { %515 = vmatprep.subr.bf16.mxu0 %v722_v0  ;;  %535 = vmatprep.subr.bf16.mxu1 %v722_v0  ;;  %v101_v24 = vld [vmem:[%s836_s2] sm:$0x1]  ;;  %v606_v39 = vld [vmem:[#allocation8 + $0x8] sm:$0xff]   ;;  %v607_v40 = vld [vmem:[#allocation8] sm:$0xff]  }
  0x3a   :  { %v198_v25 = vpack.c.bf16 %v101_v24, %v101_v24  ;;  %v224_v41 = vld [vmem:[%s838_s4] sm:$0x1]  ;;  %s688_s4 = scalar_lea.vmem %s445_s25, 256 }
  0x3b   :  { %v315_v42 = vpack.c.bf16 %v224_v41, %v224_v41  ;;  %v475_v52 = vld [vmem:[%s840_s6] ss:$0 sm:$0xff]  ;;  %p689_p6 = scmp.ne.s32.totalorder %s445_s25, %s688_s4  ;;  %p694_p8 = scmp.lt.s32.totalorder %s688_s4, %s688_s4 }
  0x3c   :  { %516 = vmatpush3.bf16.msra.mxu0 %v585_v3  ;;  %536 = vmatpush3.bf16.msra.mxu1 %v594_v8  ;;  %v200_v27 = vpack.i.b16 %v198_v25, %v198_v25 }
  0x3d   :  { %517 = vmatprep.subr.bf16.mxu0 %v722_v0  ;;  %537 = vmatprep.subr.bf16.mxu1 %v722_v0  ;;  %v317_v43 = vpack.i.b16 %v315_v42, %v315_v42  ;;  %p695_p9 = por %p694_p8, %p693_p7 }
  0x3e   :  { %v205_v31 = vrot.slane %v200_v27, %v204_v28 }
  0x3f   :  { %v322_v46 = vrot.slane %v317_v43, %v204_v28  ;;  %p696_p10 = pnand %p695_p9, %p689_p6 }
  0x40   :  { %518 = vmatpush3.bf16.msra.mxu0 %v586_v5  ;;  %538 = vmatpush3.bf16.msra.mxu1 %v595_v10 }
  0x41   :  { %519 = vmatprep.subr.bf16.mxu0 %v722_v0  ;;  %539 = vmatprep.subr.bf16.mxu1 %v722_v0 }
  0x44   :  { %520 = vmatpush3.bf16.msra.mxu0 %v587_v7  ;;  %540 = vmatpush3.bf16.msra.mxu1 %v596_v12 }
  0x45   :  { %521 = vmatprep.subr.bf16.mxu0 %v722_v0  ;;  %541 = vmatprep.subr.bf16.mxu1 %v722_v0 }
  0x48   :  { %522 = vmatpush3.bf16.msra.mxu0 %v588_v9  ;;  %542 = vmatpush3.bf16.msra.mxu1 %v597_v15 }
  0x49   :  { %523 = vmatprep.subr.bf16.mxu0 %v722_v0  ;;  %543 = vmatprep.subr.bf16.mxu1 %v722_v0 }
  0x4c   :  { %524 = vmatpush3.bf16.msra.mxu0 %v589_v11  ;;  %544 = vmatpush3.bf16.msra.mxu1 %v598_v16 }
  0x4d   :  { %525 = vmatprep.subr.bf16.mxu0 %v722_v0  ;;  %545 = vmatprep.subr.bf16.mxu1 %v722_v0 }
  0x50   :  { %526 = vmatpush3.bf16.msra.mxu0 %v590_v13  ;;  %546 = vmatpush3.bf16.msra.mxu1 %v599_v17 }
  0x51   :  { %551 = vmatprep.subr.bf16.mxu0 %v722_v0 }
  0x53   :  { %528 = vmatmul.mubr.bf16.vlgmr.msra.gmra.mxu0 %v591_v14 }
  0x54   :  { %567 = vmatprep.mubr.msk.bf16.mxu0 %vm723_vm0, %v722_v0  ;;  %552 = vmatpush3.bf16.msra.mxu0 %v600_v18 }
  0x55   :  { %553 = vmatprep.subr.bf16.mxu0 %v722_v0 }
  0x58   :  { %554 = vmatpush3.bf16.msra.mxu0 %v601_v19 }
  0x59   :  { %555 = vmatprep.subr.bf16.mxu0 %v722_v0 }
  0x5c   :  { %556 = vmatpush3.bf16.msra.mxu0 %v602_v20 }
  0x5d   :  { %557 = vmatprep.subr.bf16.mxu0 %v722_v0 }
  0x60   :  { %558 = vmatpush3.bf16.msra.mxu0 %v603_v21 }
  0x61   :  { %559 = vmatprep.subr.bf16.mxu0 %v722_v0 }
  0x64   :  { %560 = vmatpush3.bf16.msra.mxu0 %v604_v22 }
  0x65   :  { %561 = vmatprep.subr.bf16.mxu0 %v722_v0 }
  0x68   :  { %562 = vmatpush3.bf16.msra.mxu0 %v605_v38 }
  0x69   :  { %563 = vmatprep.subr.bf16.mxu0 %v722_v0 }
  0x6c   :  { %564 = vmatpush3.bf16.msra.mxu0 %v606_v39 }
  0x6d   :  { %565 = vmatprep.subr.bf16.mxu0 %v722_v0 }
  0x70   :  { %566 = vmatpush3.bf16.msra.mxu0 %v607_v40 }
 0x113   :  { %v190_v29 = vpop.f32.mrf.mxu0 }
 0x115   :  { %v529_v30 = vpop.f32.mrf.mxu0 }
 0x117   :  { %v193_v32 = vpop.f32.mrf.mxu0 }
 0x118   :  { %v197_v33 = vpack.c.bf16 %v193_v32, %v190_v29 }
 0x119   :  { %v530_v34 = vpop.f32.mrf.mxu0 }
 0x11a   :  { %v206_v35 = vadd.bf16 %v205_v31, %v197_v33 }
 0x11c   :  { %v207_v37 = vmax.bf16 %v724_v36, %v206_v35 }
 0x11e   :  { %548 = vmatmul.mubr.bf16.vlgmr.msra.gmra.mxu1 %v207_v37 }
 0x1de   :  { %v307_v44 = vpop.f32.mrf.mxu1 }
 0x1e0   :  { %v549_v45 = vpop.f32.mrf.mxu1 }
 0x1e2   :  { %v310_v47 = vpop.f32.mrf.mxu1 }
 0x1e3   :  { %v314_v48 = vpack.c.bf16 %v310_v47, %v307_v44 }
 0x1e4   :  { %v550_v49 = vpop.f32.mrf.mxu1 }
 0x1e5   :  { %v323_v50 = vadd.bf16 %v322_v46, %v314_v48 }
 0x1e7   :  { %v324_v51 = vmax.bf16 %v724_v36, %v323_v50 }
 0x1e9   :  { %568 = vmatmul.mubr.bf16.vlgmr.msra.gmra.mxu0 %v324_v51 }
 0x2a9   :  { %v430_v53 = vpop.f32.mrf.mxu0 }
 0x2aa   :  { %v431_v54 = vadd.f32 %v475_v52, %v430_v53 }
 0x2ab   :  { %v569_v55 = vpop.f32.mrf.mxu0 }
 0x2ac   :  { %437 = vst [vmem:[#allocation10] sm:$0xff] %v431_v54 }
 0x2ad   :  { %v433_v56 = vpop.f32.mrf.mxu0 }
 0x2ae   :  { %v434_v57 = vadd.f32 %v475_v52, %v433_v56 }
 0x2af   :  { %v570_v58 = vpop.f32.mrf.mxu0 }
 0x2b0   :  { %438 = vst [vmem:[#allocation10 + $0x8] sm:$0xff] %v434_v57 }
 0x2b1   :  { %699 = shalt.err (!%p696_p10)
}
 0x2b2   :  { %s726_s26 = smov 128   ;;  %s727_s6 = smov 8  }
 0x2b3   :  { %450 = dma.vmem_to_hbm [thread:$0]  %s445_s25, 256, %s841_s7, [#allocation4], %s726_s26, %s726_s26, %s727_s6  }
 0x2b4   :  { %714 = dma.done.wait [#allocation4], 256  }
 0x2b5   :  { %715 = vsyncadd [#allocation4], 4294967040 }
 0x2b6   :  { %454 = vsyncpa [#allocation3], 1 }
 0x2b7   :  { %455 = vsyncpa [#allocation6], 1 }
 0x2b8   :  { %456 = vsyncpa [#allocation9], 1 }
 0x2b9   :  { %457 = vsyncpa [#allocation4], 1 }

// kernel: _mlp_pallas.1
= control target key start
LH: loop header
LB: loop body
LE: loop exit
PB: predicated region body
PF: predicated region fallthrough
CT: control target
= control target key end

     0   :  { %12 = vsyncpa [#allocation3], 0  ;;  %s834_s0 = inlined_call_operand.hbm [shape: bf16[16,128], index: 0, kind: input, shape index: {}]   ;;  %s835_s1 = inlined_call_operand.hbm [shape: bf16[128,128], index: 1, kind: input, shape index: {}]   ;;  %s836_s2 = inlined_call_operand.vmem [shape: f32[1,128], index: 2, kind: input, shape index: {}]   ;;  %s837_s3 = inlined_call_operand.hbm [shape: bf16[128,128], index: 3, kind: input, shape index: {}]   ;;  %s838_s4 = inlined_call_operand.vmem [shape: f32[1,128], index: 4, kind: input, shape index: {}]   ;;  %s839_s5 = inlined_call_operand.hbm [shape: bf16[128,128], index: 5, kind: input, shape index: {}]   ;;  %s840_s6 = inlined_call_operand.vmem [shape: f32[1,128], index: 6, kind: input, shape index: {}]   ;;  %s841_s7 = inlined_call_operand.hbm [shape: f32[16,128], index: 7, kind: output, shape index: {}]  }
   0x1   :  { %13 = vsyncpa [#allocation6], 0 }
   0x2   :  { %14 = vsyncpa [#allocation9], 0 }
   0x3   :  { %15 = vsyncpa [#allocation4], 0  ;;  %s716_s24 = smov [#allocation5]   ;;  %s717_s26 = smov [#allocation2]  }
   0x4   :  { %s33_s25 = sshll.u32 %s716_s24, 4  ;;  %s21_s27 = sshll.u32 %s717_s26, 4  ;;  %s34_s25 = int_to_ptr.vmem [resolvable:$true] %s33_s25  ;;  %s22_s27 = int_to_ptr.vmem [resolvable:$true] %s21_s27 }
   0x5   :  { %s616_s28 = scalar_lea.vmem %s34_s25, 1024  ;;  %p621_p1 = scmp.lt.s32.totalorder %s34_s25, %s34_s25 }
   0x6   :  { %p617_p0 = scmp.ne.s32.totalorder %s34_s25, %s616_s28  ;;  %p622_p2 = scmp.lt.s32.totalorder %s616_s28, %s616_s28 }
   0x8   :  { %p623_p3 = por %p622_p2, %p621_p1 }
   0xa   :  { %p624_p4 = pnand %p623_p3, %p617_p0 }
   0xc   :  { %627 = shalt.err (!%p624_p4)
}
   0xd   :  { %s718_s29 = smov 64   ;;  %s719_s30 = smov 4  }
   0xe   :  { %39 = dma.hbm_to_vmem [thread:$0]  %s835_s1, 1024, %s34_s25, [#allocation6], %s718_s29, %s718_s29, %s719_s30  }
   0xf   :  { %s636_s10 = scalar_lea.vmem %s22_s27, 128  ;;  %p641_p6 = scmp.lt.s32.totalorder %s22_s27, %s22_s27 }
  0x10   :  { %p637_p5 = scmp.ne.s32.totalorder %s22_s27, %s636_s10  ;;  %p642_p7 = scmp.lt.s32.totalorder %s636_s10, %s636_s10 }
  0x12   :  { %p643_p8 = por %p642_p7, %p641_p6 }
  0x14   :  { %p644_p9 = pnand %p643_p8, %p637_p5 }
  0x16   :  { %647 = shalt.err (!%p644_p9)
}
  0x17   :  { %27 = dma.hbm_to_vmem [thread:$0]  %s834_s0, 128, %s22_s27, [#allocation3], %s718_s29, %s718_s29, %s719_s30  }
  0x18   :  { %s720_s13 = smov [#allocation7]   ;;  %s721_s15 = smov [#allocation8]  }
  0x19   :  { %s47_s14 = sshll.u32 %s720_s13, 4  ;;  %s61_s16 = sshll.u32 %s721_s15, 4  ;;  %s48_s14 = int_to_ptr.vmem [resolvable:$true] %s47_s14  ;;  %s62_s16 = int_to_ptr.vmem [resolvable:$true] %s61_s16 }
  0x1a   :  { %s656_s1 = scalar_lea.vmem %s48_s14, 1024  ;;  %p661_p11 = scmp.lt.s32.totalorder %s48_s14, %s48_s14 }
  0x1b   :  { %p657_p10 = scmp.ne.s32.totalorder %s48_s14, %s656_s1  ;;  %p662_p12 = scmp.lt.s32.totalorder %s656_s1, %s656_s1 }
  0x1d   :  { %p663_p13 = por %p662_p12, %p661_p11 }
  0x1f   :  { %p664_p0 = pnand %p663_p13, %p657_p10 }
  0x21   :  { %667 = shalt.err (!%p664_p0)
}
  0x22   :  { %53 = dma.hbm_to_vmem [thread:$0]  %s837_s3, 1024, %s48_s14, [#allocation6], %s718_s29, %s718_s29, %s719_s30  }
  0x23   :  { %s676_s0 = scalar_lea.vmem %s62_s16, 1024  ;;  %p681_p2 = scmp.lt.s32.totalorder %s62_s16, %s62_s16 }
  0x24   :  { %p677_p1 = scmp.ne.s32.totalorder %s62_s16, %s676_s0  ;;  %p682_p3 = scmp.lt.s32.totalorder %s676_s0, %s676_s0 }
  0x26   :  { %p683_p4 = por %p682_p3, %p681_p2 }
  0x28   :  { %p684_p5 = pnand %p683_p4, %p677_p1 }
  0x2a   :  { %687 = shalt.err (!%p684_p5)
}
  0x2b   :  { %67 = dma.hbm_to_vmem [thread:$0]  %s839_s5, 1024, %s62_s16, [#allocation9], %s718_s29, %s718_s29, %s719_s30  }
  0x2c   :  { %708 = dma.done.wait [#allocation3], 128  }
  0x2d   :  { %709 = vsyncadd [#allocation3], 4294967168 }
  0x2e   :  { %710 = dma.done.wait [#allocation6], 2048  }
  0x2f   :  { %711 = vsyncadd [#allocation6], 4294965248 }
  0x30   :  { %712 = dma.done.wait [#allocation9], 1024  }
  0x31   :  { %713 = vsyncadd [#allocation9], 4294966272  ;;  %v722_v0 = vmov 0.0   ;;  %vm723_vm0 = vmmov 0   ;;  %v583_v1 = vld [vmem:[#allocation5 + $0x38] sm:$0xff]   ;;  %v584_v2 = vld [vmem:[#allocation5 + $0x30] sm:$0xff]   ;;  %v202_v23 = vlaneseq }
  0x32   :  { %511 = vmatprep.subr.bf16.mxu0 %v722_v0  ;;  %527 = vmatprep.mubr.msk.bf16.mxu0 %vm723_vm0, %v722_v0  ;;  %v585_v3 = vld [vmem:[#allocation5 + $0x28] sm:$0xff]   ;;  %v592_v4 = vld [vmem:[#allocation7 + $0x38] sm:$0xff]   ;;  %v586_v5 = vld [vmem:[#allocation5 + $0x20] sm:$0xff]   ;;  %v724_v36 = vmov 0   ;;  %s725_s24 = smov [#allocation10]  }
  0x33   :  { %531 = vmatprep.subr.bf16.mxu1 %v722_v0  ;;  %547 = vmatprep.mubr.msk.bf16.mxu1 %vm723_vm0, %v722_v0  ;;  %v593_v6 = vld [vmem:[#allocation7 + $0x30] sm:$0xff]   ;;  %v587_v7 = vld [vmem:[#allocation5 + $0x18] sm:$0xff]   ;;  %v594_v8 = vld [vmem:[#allocation7 + $0x28] sm:$0xff]   ;;  %v203_v26 = vshrl.u32 %v202_v23, 7  ;;  %s444_s25 = sshll.u32 %s725_s24, 4  ;;  %s445_s25 = int_to_ptr.vmem [resolvable:$true] %s444_s25 }
  0x34   :  { %512 = vmatpush3.bf16.msra.mxu0 %v583_v1  ;;  %532 = vmatpush3.bf16.msra.mxu1 %v592_v4  ;;  %v588_v9 = vld [vmem:[#allocation5 + $0x10] sm:$0xff]   ;;  %v595_v10 = vld [vmem:[#allocation7 + $0x20] sm:$0xff]   ;;  %v589_v11 = vld [vmem:[#allocation5 + $0x8] sm:$0xff]   ;;  %p693_p7 = scmp.lt.s32.totalorder %s445_s25, %s445_s25 }
  0x35   :  { %513 = vmatprep.subr.bf16.mxu0 %v722_v0  ;;  %533 = vmatprep.subr.bf16.mxu1 %v722_v0  ;;  %v596_v12 = vld [vmem:[#allocation7 + $0x18] sm:$0xff]   ;;  %v590_v13 = vld [vmem:[#allocation5] sm:$0xff]   ;;  %v597_v15 = vld [vmem:[#allocation7 + $0x10] sm:$0xff]   ;;  %v204_v28 = vsub.s32 0, %v203_v26 }
  0x36   :  { %v591_v14 = vld [vmem:[#allocation2] sm:$0xff]   ;;  %v598_v16 = vld [vmem:[#allocation7 + $0x8] sm:$0xff]   ;;  %v599_v17 = vld [vmem:[#allocation7] sm:$0xff]  }
  0x37   :  { %v600_v18 = vld [vmem:[#allocation8 + $0x38] sm:$0xff]   ;;  %v601_v19 = vld [vmem:[#allocation8 + $0x30] sm:$0xff]   ;;  %v602_v20 = vld [vmem:[#allocation8 + $0x28] sm:$0xff]  }
  0x38   :  { %514 = vmatpush3.bf16.msra.mxu0 %v584_v2  ;;  %534 = vmatpush3.bf16.msra.mxu1 %v593_v6  ;;  %v603_v21 = vld [vmem:[#allocation8 + $0x20] sm:$0xff]   ;;  %v604_v22 = vld [vmem:[#allocation8 + $0x18] sm:$0xff]   ;;  %v605_v38 = vld [vmem:[#allocation8 + $0x10] sm:$0xff]  }
  0x39   :  { %515 = vmatprep.subr.bf16.mxu0 %v722_v0  ;;  %535 = vmatprep.subr.bf16.mxu1 %v722_v0  ;;  %v101_v24 = vld [vmem:[%s836_s2] sm:$0x1]  ;;  %v606_v39 = vld [vmem:[#allocation8 + $0x8] sm:$0xff]   ;;  %v607_v40 = vld [vmem:[#allocation8] sm:$0xff]  }
  0x3a   :  { %v198_v25 = vpack.c.bf16 %v101_v24, %v101_v24  ;;  %v224_v41 = vld [vmem:[%s838_s4] sm:$0x1]  ;;  %s688_s4 = scalar_lea.vmem %s445_s25, 256 }
  0x3b   :  { %v315_v42 = vpack.c.bf16 %v224_v41, %v224_v41  ;;  %v475_v52 = vld [vmem:[%s840_s6] ss:$0 sm:$0xff]  ;;  %p689_p6 = scmp.ne.s32.totalorder %s445_s25, %s688_s4  ;;  %p694_p8 = scmp.lt.s32.totalorder %s688_s4, %s688_s4 }
  0x3c   :  { %516 = vmatpush3.bf16.msra.mxu0 %v585_v3  ;;  %536 = vmatpush3.bf16.msra.mxu1 %v594_v8  ;;  %v200_v27 = vpack.i.b16 %v198_v25, %v198_v25 }
  0x3d   :  { %517 = vmatprep.subr.bf16.mxu0 %v722_v0  ;;  %537 = vmatprep.subr.bf16.mxu1 %v722_v0  ;;  %v317_v43 = vpack.i.b16 %v315_v42, %v315_v42  ;;  %p695_p9 = por %p694_p8, %p693_p7 }
  0x3e   :  { %v205_v31 = vrot.slane %v200_v27, %v204_v28 }
  0x3f   :  { %v322_v46 = vrot.slane %v317_v43, %v204_v28  ;;  %p696_p10 = pnand %p695_p9, %p689_p6 }
  0x40   :  { %518 = vmatpush3.bf16.msra.mxu0 %v586_v5  ;;  %538 = vmatpush3.bf16.msra.mxu1 %v595_v10 }
  0x41   :  { %519 = vmatprep.subr.bf16.mxu0 %v722_v0  ;;  %539 = vmatprep.subr.bf16.mxu1 %v722_v0 }
  0x44   :  { %520 = vmatpush3.bf16.msra.mxu0 %v587_v7  ;;  %540 = vmatpush3.bf16.msra.mxu1 %v596_v12 }
  0x45   :  { %521 = vmatprep.subr.bf16.mxu0 %v722_v0  ;;  %541 = vmatprep.subr.bf16.mxu1 %v722_v0 }
  0x48   :  { %522 = vmatpush3.bf16.msra.mxu0 %v588_v9  ;;  %542 = vmatpush3.bf16.msra.mxu1 %v597_v15 }
  0x49   :  { %523 = vmatprep.subr.bf16.mxu0 %v722_v0  ;;  %543 = vmatprep.subr.bf16.mxu1 %v722_v0 }
  0x4c   :  { %524 = vmatpush3.bf16.msra.mxu0 %v589_v11  ;;  %544 = vmatpush3.bf16.msra.mxu1 %v598_v16 }
  0x4d   :  { %525 = vmatprep.subr.bf16.mxu0 %v722_v0  ;;  %545 = vmatprep.subr.bf16.mxu1 %v722_v0 }
  0x50   :  { %526 = vmatpush3.bf16.msra.mxu0 %v590_v13  ;;  %546 = vmatpush3.bf16.msra.mxu1 %v599_v17 }
  0x51   :  { %551 = vmatprep.subr.bf16.mxu0 %v722_v0 }
  0x53   :  { %528 = vmatmul.mubr.bf16.vlgmr.msra.gmra.mxu0 %v591_v14 }
  0x54   :  { %567 = vmatprep.mubr.msk.bf16.mxu0 %vm723_vm0, %v722_v0  ;;  %552 = vmatpush3.bf16.msra.mxu0 %v600_v18 }
  0x55   :  { %553 = vmatprep.subr.bf16.mxu0 %v722_v0 }
  0x58   :  { %554 = vmatpush3.bf16.msra.mxu0 %v601_v19 }
  0x59   :  { %555 = vmatprep.subr.bf16.mxu0 %v722_v0 }
  0x5c   :  { %556 = vmatpush3.bf16.msra.mxu0 %v602_v20 }
  0x5d   :  { %557 = vmatprep.subr.bf16.mxu0 %v722_v0 }
  0x60   :  { %558 = vmatpush3.bf16.msra.mxu0 %v603_v21 }
  0x61   :  { %559 = vmatprep.subr.bf16.mxu0 %v722_v0 }
  0x64   :  { %560 = vmatpush3.bf16.msra.mxu0 %v604_v22 }
  0x65   :  { %561 = vmatprep.subr.bf16.mxu0 %v722_v0 }
  0x68   :  { %562 = vmatpush3.bf16.msra.mxu0 %v605_v38 }
  0x69   :  { %563 = vmatprep.subr.bf16.mxu0 %v722_v0 }
  0x6c   :  { %564 = vmatpush3.bf16.msra.mxu0 %v606_v39 }
  0x6d   :  { %565 = vmatprep.subr.bf16.mxu0 %v722_v0 }
  0x70   :  { %566 = vmatpush3.bf16.msra.mxu0 %v607_v40 }
 0x113   :  { %v190_v29 = vpop.f32.mrf.mxu0 }
 0x115   :  { %v529_v30 = vpop.f32.mrf.mxu0 }
 0x117   :  { %v193_v32 = vpop.f32.mrf.mxu0 }
 0x118   :  { %v197_v33 = vpack.c.bf16 %v193_v32, %v190_v29 }
 0x119   :  { %v530_v34 = vpop.f32.mrf.mxu0 }
 0x11a   :  { %v206_v35 = vadd.bf16 %v205_v31, %v197_v33 }
 0x11c   :  { %v207_v37 = vmax.bf16 %v724_v36, %v206_v35 }
 0x11e   :  { %548 = vmatmul.mubr.bf16.vlgmr.msra.gmra.mxu1 %v207_v37 }
 0x1de   :  { %v307_v44 = vpop.f32.mrf.mxu1 }
 0x1e0   :  { %v549_v45 = vpop.f32.mrf.mxu1 }
 0x1e2   :  { %v310_v47 = vpop.f32.mrf.mxu1 }
 0x1e3   :  { %v314_v48 = vpack.c.bf16 %v310_v47, %v307_v44 }
 0x1e4   :  { %v550_v49 = vpop.f32.mrf.mxu1 }
 0x1e5   :  { %v323_v50 = vadd.bf16 %v322_v46, %v314_v48 }
 0x1e7   :  { %v324_v51 = vmax.bf16 %v724_v36, %v323_v50 }
 0x1e9   :  { %568 = vmatmul.mubr.bf16.vlgmr.msra.gmra.mxu0 %v324_v51 }
 0x2a9   :  { %v430_v53 = vpop.f32.mrf.mxu0 }
 0x2aa   :  { %v431_v54 = vadd.f32 %v475_v52, %v430_v53 }
 0x2ab   :  { %v569_v55 = vpop.f32.mrf.mxu0 }
 0x2ac   :  { %437 = vst [vmem:[#allocation10] sm:$0xff] %v431_v54 }
 0x2ad   :  { %v433_v56 = vpop.f32.mrf.mxu0 }
 0x2ae   :  { %v434_v57 = vadd.f32 %v475_v52, %v433_v56 }
 0x2af   :  { %v570_v58 = vpop.f32.mrf.mxu0 }
 0x2b0   :  { %438 = vst [vmem:[#allocation10 + $0x8] sm:$0xff] %v434_v57 }
 0x2b1   :  { %699 = shalt.err (!%p696_p10)
}
 0x2b2   :  { %s726_s26 = smov 128   ;;  %s727_s6 = smov 8  }
 0x2b3   :  { %450 = dma.vmem_to_hbm [thread:$0]  %s445_s25, 256, %s841_s7, [#allocation4], %s726_s26, %s726_s26, %s727_s6  }
 0x2b4   :  { %714 = dma.done.wait [#allocation4], 256  }
 0x2b5   :  { %715 = vsyncadd [#allocation4], 4294967040 }
 0x2b6   :  { %454 = vsyncpa [#allocation3], 1 }
 0x2b7   :  { %455 = vsyncpa [#allocation6], 1 }
 0x2b8   :  { %456 = vsyncpa [#allocation9], 1 }
 0x2b9   :  { %457 = vsyncpa [#allocation4], 1 }

</bundles_post_ra>
